<compile_context>
chip_gen: v7x
topology: tpu7x:2x2x1
jax: 0.10.0
libtpu: 0.0.40
codegen_flags: <defaults>
</compile_context>

<pallas_src>
import functools

import jax
import jax.numpy as jnp
import numpy as np
from jax.experimental import pallas as pl
from jax.experimental.pallas import tpu as pltpu

NUM_SELECTORS = 5
NUM_SELECTORS_PAD = 8  # padded selector-score columns in the kernel output


def _round_up(x, m):
    return (x + m - 1) // m * m


def _multi_tc_chip():
    """Best-effort: True on chips with >1 TensorCore (v7x)."""
    try:
        kind = jax.devices()[0].device_kind.lower()
        return ("v7" in kind) or ("7x" in kind)
    except Exception:
        return False


def selective_kernel(x_ref, wt_ref, b_ref, wn_ref, logits_ref, scores_ref,
                     *, num_classes):
    """One (batch-tile i, K-tile k) grid step.

    x_ref      : [TB, TD]  bf16  flattened-feature tile
    wt_ref     : [TD, Cp]  bf16  head weight tile (pre-transposed, K-major)
    b_ref      : [1,  Cp]  f32   bias (padded classes are 0)
    wn_ref     : [1,  Cp]  f32   per-class weight row norms (precomputed)
    logits_ref : [TB, Cp]  f32   logits output tile; doubles as the f32
                                 accumulator (block index constant across k)
    scores_ref : [TB, 8]   f32   raw selector scores (cols 0..4 used)
    """
    k = pl.program_id(1)

    @pl.when(k == 0)
    def _():
        logits_ref[...] = jnp.zeros_like(logits_ref)

    # MXU: bf16 operands, f32 accumulation directly into the output block.
    logits_ref[...] += jax.lax.dot_general(
        x_ref[...], wt_ref[...],
        dimension_numbers=(((1,), (0,)), ((), ())),
        preferred_element_type=jnp.float32)

    @pl.when(k == pl.num_programs(1) - 1)
    def _():
        logits = logits_ref[...] + b_ref[...]                    # [TB, Cp] f32
        logits_ref[...] = logits

        tb, cp = logits.shape
        # Column-index iota: a single (1, Cp) row, broadcast in comparisons.
        col = jax.lax.broadcasted_iota(jnp.int32, (1, cp), 1)
        valid = col < num_classes
        neg_inf = jnp.float32(-jnp.inf)
        logits_m = jnp.where(valid, logits, neg_inf)

        # ---- softmax over valid classes ----
        mx = jnp.max(logits_m, axis=1, keepdims=True)
        ex = jnp.exp(logits_m - mx)                    # exp(-inf) = 0 on pads
        denom = jnp.sum(ex, axis=1, keepdims=True)
        probs = ex * pl.reciprocal(denom, approx=True)

        # SRMaxSelector
        s_max = jnp.max(probs, axis=1, keepdims=True)
        # SRDoctorSelector: 1 - 1/||p||_2^2  (exact reciprocal: feeds z-norm)
        pn2 = jnp.sum(probs * probs, axis=1, keepdims=True)
        s_doc = 1.0 - 1.0 / pn2
        # SREntropySelector
        s_ent = -jnp.sum(probs * jnp.log(probs + 1e-10), axis=1, keepdims=True)

        def top2_margin(v):
            m1 = jnp.max(v, axis=1, keepdims=True)
            # first occurrence of the max (ties -> margin 0, like torch.sort)
            first_max = jnp.min(jnp.where(v == m1, col, cp), axis=1,
                                keepdims=True)
            m2 = jnp.max(jnp.where(col == first_max, neg_inf, v), axis=1,
                         keepdims=True)
            return m1 - m2

        # RLGeoMSelector: margin of logits scaled by 1/(||w_c||_2 + 1e-8)
        inv_wn = 1.0 / (wn_ref[...] + 1e-8)                      # [1, Cp]
        geo = jnp.where(valid, logits * inv_wn, neg_inf)
        s_geo = top2_margin(geo)
        # RLConfMSelector: raw-logit margin
        s_conf = top2_margin(logits_m)

        # Single lane-dense store of the (TB, 8) score block (no 1-lane slice
        # stores): compose with selects against a tiny lane iota.
        col8 = jax.lax.broadcasted_iota(jnp.int32, scores_ref.shape, 1)
        scores = jnp.zeros(scores_ref.shape, jnp.float32)
        scores = jnp.where(col8 == 0, s_max, scores)
        scores = jnp.where(col8 == 1, s_doc, scores)
        scores = jnp.where(col8 == 2, s_ent, scores)
        scores = jnp.where(col8 == 3, s_geo, scores)
        scores = jnp.where(col8 == 4, s_conf, scores)
        scores_ref[...] = scores


def _combine_scores(raw_scores, selector_weights):
    """Batch z-norm (torch unbiased std) + softmax-weighted combine.

    O(B*5) work, done in plain JAX so the kernel's batch axis stays tileable.
    Note: B == 1 yields NaN (ddof=1), same as the PyTorch reference.
    """
    mean = jnp.mean(raw_scores, axis=0, keepdims=True)
    std = jnp.std(raw_scores, axis=0, keepdims=True, ddof=1)
    z = (raw_scores - mean) / (std + 1e-8)
    wts = jax.nn.softmax(selector_weights)
    return jnp.sum(z * wts[None, :], axis=1)


def selective_forward(x, head_w, head_b, selector_weights, *, tb=None, td=None):
    """Returns (logits [B, C], combined_scores [B]) like SelectiveNetwork.forward."""
    B = x.shape[0]
    D = int(np.prod(x.shape[1:]))
    C = head_w.shape[0]
    c_pad = _round_up(C, 128)
    d_pad128 = _round_up(D, 128)

    # ---- batch tile: fill the 256-wide MXU / halve weight re-streaming ----
    auto_tb = tb is None
    if auto_tb:
        if B >= 512:
            tb = 512
        elif B >= 256:
            tb = 256
        else:
            tb = _round_up(B, 8)
    b_pad = _round_up(B, tb)
    if auto_tb and _multi_tc_chip() and (b_pad // tb) < 2 and b_pad >= 16:
        # v7x: make sure the "parallel" batch axis has >= 2 iterations so both
        # TensorCores get work (harmless elsewhere; skipped on v5e/v6e).
        tb = _round_up(b_pad // 2, 8)
        b_pad = _round_up(B, tb)

    # ---- K tile: large, dividing round_up(D,128) so the x pad is a no-op;
    # whole-weight residency when the pre-transposed weight is small ----
    if td is None:
        if d_pad128 * c_pad * 2 <= 12 * 1024 * 1024:
            td = d_pad128                      # single K tile, weight resident
        else:
            td = 2048
            for cand in (2048, 1536, 1024, 512, 256, 128):
                if d_pad128 % cand == 0:
                    td = cand
                    break
    d_pad = _round_up(D, td)

    # ---- operand prep (no f32 intermediate for x; one transpose of W) ----
    x_p = x.reshape(B, D).astype(jnp.bfloat16)
    if (b_pad, d_pad) != (B, D):
        x_p = jnp.pad(x_p, ((0, b_pad - B), (0, d_pad - D)))

    wt_p = head_w.T.astype(jnp.bfloat16)
    if (d_pad, c_pad) != (D, C):
        wt_p = jnp.pad(wt_p, ((0, d_pad - D), (0, c_pad - C)))

    b_p = jnp.pad(head_b.astype(jnp.float32)[None, :], ((0, 0), (0, c_pad - C)))
    # Weight-only constant: per-class row norms, precomputed once per call.
    w_norms = jnp.sqrt(jnp.sum(jnp.square(head_w.astype(jnp.float32)), axis=1))
    wn_p = jnp.pad(w_norms[None, :], ((0, 0), (0, c_pad - C)))

    grid = (b_pad // tb, d_pad // td)
    kernel = functools.partial(selective_kernel, num_classes=C)

    # Double-buffered VMEM footprint (+2x margin, capped well below the 64 MiB
    # physical per-TC VMEM of v7x).
    footprint = 2 * (tb * td * 2          # x tile (bf16)
                     + td * c_pad * 2     # W.T tile (bf16)
                     + 2 * c_pad * 4      # bias + w_norms rows
                     + tb * c_pad * 4     # logits output block
                     + tb * NUM_SELECTORS_PAD * 4)
    vmem_limit = int(min(max(2 * footprint, 8 * 1024 * 1024),
                         48 * 1024 * 1024))

    logits_p, raw_p = pl.pallas_call(
        kernel,
        out_shape=(jax.ShapeDtypeStruct((b_pad, c_pad), jnp.float32),
                   jax.ShapeDtypeStruct((b_pad, NUM_SELECTORS_PAD), jnp.float32)),
        grid_spec=pltpu.PrefetchScalarGridSpec(
            num_scalar_prefetch=0,
            grid=grid,
            in_specs=[
                pl.BlockSpec((tb, td), lambda i, k: (i, k)),        # x tile
                # Constant block index across i when grid[1]==1 -> the weight
                # stays VMEM-resident and is never re-streamed per batch tile.
                # (If a profile shows exposed weight DMA in the streamed case,
                #  add pipeline_mode=pl.Buffered(3) here and re-check VMEM.)
                pl.BlockSpec((td, c_pad), lambda i, k: (k, 0)),     # W.T tile
                pl.BlockSpec((1, c_pad), lambda i, k: (0, 0)),      # bias
                pl.BlockSpec((1, c_pad), lambda i, k: (0, 0)),      # w_norms
            ],
            out_specs=(
                pl.BlockSpec((tb, c_pad), lambda i, k: (i, 0)),     # logits
                pl.BlockSpec((tb, NUM_SELECTORS_PAD), lambda i, k: (i, 0)),
            ),
        ),
        compiler_params=pltpu.CompilerParams(
            dimension_semantics=("parallel", "arbitrary"),
            vmem_limit_bytes=vmem_limit,
        ),
    )(x_p, wt_p, b_p, wn_p)

    logits = logits_p[:B, :C]
    raw_scores = raw_p[:B, :NUM_SELECTORS]
    combined = _combine_scores(raw_scores, selector_weights.astype(jnp.float32))
    return logits, combined


def _reference(x, w, b, selector_weights):
    """Pure-JAX reference mirroring the PyTorch forward.

    The head matmul uses the same bf16-operand / f32-accumulation recipe as the
    kernel (a deliberate perf choice); all selector math is exact f32.
    """
    B = x.shape[0]
    xf = x.reshape(B, -1)
    logits = jnp.dot(xf.astype(jnp.bfloat16), w.astype(jnp.bfloat16).T,
                     preferred_element_type=jnp.float32) + b

    probs = jax.nn.softmax(logits, axis=1)
    s_max = jnp.max(probs, axis=1)
    s_doc = 1.0 - 1.0 / jnp.sum(probs ** 2, axis=1)
    s_ent = -jnp.sum(probs * jnp.log(probs + 1e-10), axis=1)

    def margin(v):
        srt = jnp.sort(v, axis=1)[:, ::-1]
        return srt[:, 0] - srt[:, 1]

    w_norms = jnp.linalg.norm(w, axis=1)
    s_geo = margin(logits / (w_norms + 1e-8)[None, :])
    s_conf = margin(logits)

    def zn(s):
        return (s - s.mean()) / (jnp.std(s, ddof=1) + 1e-8)

    stacked = jnp.stack([zn(s) for s in (s_max, s_doc, s_ent, s_geo, s_conf)])
    wts = jax.nn.softmax(selector_weights)
    combined = jnp.sum(wts[:, None] * stacked, axis=0)
    return logits, combined


if __name__ == "__main__":
    key = jax.random.PRNGKey(0)
    k_x, k_w, k_b = jax.random.split(key, 3)

    B, C_in, H, W_sp = 2, 4, 16, 16
    NUM_CLASSES = 16
    D = C_in * H * W_sp

    x = jax.random.normal(k_x, (B, C_in, H, W_sp), dtype=jnp.float32)
    head_w = 0.02 * jax.random.normal(k_w, (NUM_CLASSES, D), dtype=jnp.float32)
    head_b = 0.01 * jax.random.normal(k_b, (NUM_CLASSES,), dtype=jnp.float32)
    # nn.Parameter(torch.ones(5) / 5)
    selector_weights = jnp.ones((NUM_SELECTORS,), dtype=jnp.float32) / NUM_SELECTORS

    logits, scores = selective_forward(x, head_w, head_b, selector_weights)
    jax.block_until_ready((logits, scores))

    ref_logits, ref_scores = _reference(x, head_w, head_b, selector_weights)
    np.testing.assert_allclose(np.asarray(logits), np.asarray(ref_logits),
                               rtol=1e-3, atol=2e-3)
    np.testing.assert_allclose(np.asarray(scores), np.asarray(ref_scores),
                               rtol=1e-3, atol=2e-3)

    print("KERNEL_OK")
</pallas_src>

<mosaic_0001>
module attributes {stable_mosaic.version = 11 : i64} {
  func.func @selective_kernel(%arg0: i32, %arg1: i32, %arg2: memref<8x1024xbf16, #tpu.memory_space<vmem>>, %arg3: memref<1024x128xbf16, #tpu.memory_space<vmem>>, %arg4: memref<1x128xf32, #tpu.memory_space<vmem>>, %arg5: memref<1x128xf32, #tpu.memory_space<vmem>>, %arg6: memref<8x128xf32, #tpu.memory_space<vmem>>, %arg7: memref<8x8xf32, #tpu.memory_space<vmem>>) attributes {dimension_semantics = [#tpu.dimension_semantics<parallel>, #tpu.dimension_semantics<arbitrary>], iteration_bounds = array<i64: 1, 1>, scalar_prefetch = 0 : i64, scratch_operands = 0 : i64, tpu.core_type = #tpu.core_type<tc>, window_params = [{transform_indices = @transform_0, window_bounds = array<i64: 8, 1024>}, {transform_indices = @transform_1, window_bounds = array<i64: 1024, 128>}, {pipeline_mode = #tpu.pipeline_mode<synchronous>, transform_indices = @transform_2, window_bounds = array<i64: 1, 128>}, {pipeline_mode = #tpu.pipeline_mode<synchronous>, transform_indices = @transform_3, window_bounds = array<i64: 1, 128>}, {transform_indices = @transform_4, window_bounds = array<i64: 8, 128>}, {transform_indices = @transform_5, window_bounds = array<i64: 8, 8>}]} {
    %c0_i32 = arith.constant 0 : i32
    %0 = arith.cmpi eq, %arg1, %c0_i32 : i32
    %1 = arith.extui %0 : i1 to i32
    %c0_i32_0 = arith.constant 0 : i32
    %2 = arith.cmpi ne, %1, %c0_i32_0 : i32
    scf.if %2 {
      %cst_10 = arith.constant 0.000000e+00 : f32
      %12 = vector.broadcast %cst_10 : f32 to vector<8x128xf32>
      %c0_11 = arith.constant 0 : index
      %c0_12 = arith.constant 0 : index
      %13 = vector.load %arg6[%c0_11, %c0_12] : memref<8x128xf32, #tpu.memory_space<vmem>>, vector<8x128xf32>
      tpu.vector_store %arg6[%c0_11, %c0_12], %12 {strides = array<i32>} : memref<8x128xf32, #tpu.memory_space<vmem>>, vector<8x128xf32>,
    } else {
    }
    %c0 = arith.constant 0 : index
    %c0_1 = arith.constant 0 : index
    %3 = vector.load %arg6[%c0, %c0_1] : memref<8x128xf32, #tpu.memory_space<vmem>>, vector<8x128xf32>
    %c0_2 = arith.constant 0 : index
    %c0_3 = arith.constant 0 : index
    %4 = vector.load %arg2[%c0_2, %c0_3] : memref<8x1024xbf16, #tpu.memory_space<vmem>>, vector<8x1024xbf16>
    %c0_4 = arith.constant 0 : index
    %c0_5 = arith.constant 0 : index
    %5 = vector.load %arg3[%c0_4, %c0_5] : memref<1024x128xbf16, #tpu.memory_space<vmem>>, vector<1024x128xbf16>
    %cst = arith.constant dense<0.000000e+00> : vector<8x128xf32>
    %6 = tpu.matmul %4, %5, %cst {dimension_numbers = #tpu.dot_dimension_numbers<[1], [0], [0], [1], [0, 0, 1, 1], [], []>} : vector<8x1024xbf16>, vector<1024x128xbf16>, vector<8x128xf32> -> vector<8x128xf32>
    %7 = arith.addf %3, %6 : vector<8x128xf32>
    %c0_6 = arith.constant 0 : index
    %c0_7 = arith.constant 0 : index
    %8 = vector.load %arg6[%c0_6, %c0_7] : memref<8x128xf32, #tpu.memory_space<vmem>>, vector<8x128xf32>
    tpu.vector_store %arg6[%c0_6, %c0_7], %7 {strides = array<i32>} : memref<8x128xf32, #tpu.memory_space<vmem>>, vector<8x128xf32>,
    %c0_i32_8 = arith.constant 0 : i32
    %9 = arith.cmpi eq, %arg1, %c0_i32_8 : i32
    %10 = arith.extui %9 : i1 to i32
    %c0_i32_9 = arith.constant 0 : i32
    %11 = arith.cmpi ne, %10, %c0_i32_9 : i32
    scf.if %11 {
      %c0_10 = arith.constant 0 : index
      %c0_11 = arith.constant 0 : index
      %12 = vector.load %arg6[%c0_10, %c0_11] : memref<8x128xf32, #tpu.memory_space<vmem>>, vector<8x128xf32>
      %c0_12 = arith.constant 0 : index
      %c0_13 = arith.constant 0 : index
      %13 = vector.load %arg4[%c0_12, %c0_13] : memref<1x128xf32, #tpu.memory_space<vmem>>, vector<1x128xf32>
      %14 = vector.broadcast %13 : vector<1x128xf32> to vector<8x128xf32>
      %15 = arith.addf %12, %14 : vector<8x128xf32>
      %c0_14 = arith.constant 0 : index
      %c0_15 = arith.constant 0 : index
      %16 = vector.load %arg6[%c0_14, %c0_15] : memref<8x128xf32, #tpu.memory_space<vmem>>, vector<8x128xf32>
      tpu.vector_store %arg6[%c0_14, %c0_15], %15 {strides = array<i32>} : memref<8x128xf32, #tpu.memory_space<vmem>>, vector<8x128xf32>,
      %17 = tpu.iota {dimensions = array<i32: 1>} : vector<1x128xi32>
      %c16_i32 = arith.constant 16 : i32
      %18 = vector.broadcast %c16_i32 : i32 to vector<1x128xi32>
      %19 = arith.cmpi slt, %17, %18 : vector<1x128xi32>
      %cst_16 = arith.constant 0xFF800000 : f32
      %20 = vector.shape_cast %19 : vector<1x128xi1> to vector<1x128xi1>
      %21 = vector.broadcast %20 : vector<1x128xi1> to vector<8x128xi1>
      %22 = vector.broadcast %cst_16 : f32 to vector<8x128xf32>
      %23 = arith.select %21, %15, %22 : vector<8x128xi1>, vector<8x128xf32>
      %cst_17 = arith.constant dense<0xFF800000> : vector<8xf32>
      %24 = vector.multi_reduction <maximumf>, %23, %cst_17 [1] : vector<8x128xf32> to vector<8xf32>
      %25 = vector.shape_cast %24 : vector<8xf32> to vector<8x1xf32>
      %26 = vector.broadcast %25 : vector<8x1xf32> to vector<8x128xf32>
      %27 = arith.subf %23, %26 : vector<8x128xf32>
      %28 = math.exp %27 : vector<8x128xf32>
      %cst_18 = arith.constant dense<0.000000e+00> : vector<8xf32>
      %29 = vector.multi_reduction <add>, %28, %cst_18 [1] : vector<8x128xf32> to vector<8xf32>
      %30 = vector.shape_cast %29 : vector<8xf32> to vector<8x1xf32>
      %31 = tpu.reciprocal %30 {approx = true} : vector<8x1xf32> -> vector<8x1xf32>
      %32 = vector.broadcast %31 : vector<8x1xf32> to vector<8x128xf32>
      %33 = arith.mulf %28, %32 : vector<8x128xf32>
      %cst_19 = arith.constant dense<0xFF800000> : vector<8xf32>
      %34 = vector.multi_reduction <maximumf>, %33, %cst_19 [1] : vector<8x128xf32> to vector<8xf32>
      %35 = vector.shape_cast %34 : vector<8xf32> to vector<8x1xf32>
      %36 = arith.mulf %33, %33 : vector<8x128xf32>
      %cst_20 = arith.constant dense<0.000000e+00> : vector<8xf32>
      %37 = vector.multi_reduction <add>, %36, %cst_20 [1] : vector<8x128xf32> to vector<8xf32>
      %38 = vector.shape_cast %37 : vector<8xf32> to vector<8x1xf32>
      %cst_21 = arith.constant 1.000000e+00 : f32
      %39 = vector.broadcast %cst_21 : f32 to vector<8x1xf32>
      %40 = arith.divf %39, %38 : vector<8x1xf32>
      %cst_22 = arith.constant 1.000000e+00 : f32
      %41 = vector.broadcast %cst_22 : f32 to vector<8x1xf32>
      %42 = arith.subf %41, %40 : vector<8x1xf32>
      %cst_23 = arith.constant 1.000000e-10 : f32
      %43 = vector.broadcast %cst_23 : f32 to vector<8x128xf32>
      %44 = arith.addf %33, %43 : vector<8x128xf32>
      %45 = math.log %44 : vector<8x128xf32>
      %46 = arith.mulf %33, %45 : vector<8x128xf32>
      %cst_24 = arith.constant dense<0.000000e+00> : vector<8xf32>
      %47 = vector.multi_reduction <add>, %46, %cst_24 [1] : vector<8x128xf32> to vector<8xf32>
      %48 = vector.shape_cast %47 : vector<8xf32> to vector<8x1xf32>
      %cst_25 = arith.constant 0.000000e+00 : f32
      %49 = vector.broadcast %cst_25 : f32 to vector<8x1xf32>
      %50 = arith.subf %49, %48 : vector<8x1xf32>
      %c0_26 = arith.constant 0 : index
      %c0_27 = arith.constant 0 : index
      %51 = vector.load %arg5[%c0_26, %c0_27] : memref<1x128xf32, #tpu.memory_space<vmem>>, vector<1x128xf32>
      %cst_28 = arith.constant 9.99999993E-9 : f32
      %52 = vector.broadcast %cst_28 : f32 to vector<1x128xf32>
      %53 = arith.addf %51, %52 : vector<1x128xf32>
      %cst_29 = arith.constant 1.000000e+00 : f32
      %54 = vector.broadcast %cst_29 : f32 to vector<1x128xf32>
      %55 = arith.divf %54, %53 : vector<1x128xf32>
      %56 = vector.broadcast %55 : vector<1x128xf32> to vector<8x128xf32>
      %57 = arith.mulf %15, %56 : vector<8x128xf32>
      %cst_30 = arith.constant 0xFF800000 : f32
      %58 = vector.shape_cast %19 : vector<1x128xi1> to vector<1x128xi1>
      %59 = vector.broadcast %58 : vector<1x128xi1> to vector<8x128xi1>
      %60 = vector.broadcast %cst_30 : f32 to vector<8x128xf32>
      %61 = arith.select %59, %57, %60 : vector<8x128xi1>, vector<8x128xf32>
      %cst_31 = arith.constant dense<0xFF800000> : vector<8xf32>
      %62 = vector.multi_reduction <maximumf>, %61, %cst_31 [1] : vector<8x128xf32> to vector<8xf32>
      %63 = vector.shape_cast %62 : vector<8xf32> to vector<8x1xf32>
      %64 = vector.broadcast %63 : vector<8x1xf32> to vector<8x128xf32>
      %65 = arith.cmpf oeq, %61, %64 : vector<8x128xf32>
      %c128_i32 = arith.constant 128 : i32
      %66 = vector.shape_cast %17 : vector<1x128xi32> to vector<1x128xi32>
      %67 = vector.broadcast %66 : vector<1x128xi32> to vector<8x128xi32>
      %68 = vector.broadcast %c128_i32 : i32 to vector<8x128xi32>
      %69 = arith.select %65, %67, %68 : vector<8x128xi1>, vector<8x128xi32>
      %cst_32 = arith.constant dense<2147483647> : vector<8xi32>
      %70 = vector.multi_reduction <minsi>, %69, %cst_32 [1] : vector<8x128xi32> to vector<8xi32>
      %71 = vector.shape_cast %70 : vector<8xi32> to vector<8x1xi32>
      %72 = vector.broadcast %17 : vector<1x128xi32> to vector<8x128xi32>
      %73 = vector.broadcast %71 : vector<8x1xi32> to vector<8x128xi32>
      %74 = arith.cmpi eq, %72, %73 : vector<8x128xi32>
      %cst_33 = arith.constant 0xFF800000 : f32
      %75 = vector.broadcast %cst_33 : f32 to vector<8x128xf32>
      %76 = arith.select %74, %75, %61 : vector<8x128xi1>, vector<8x128xf32>
      %cst_34 = arith.constant dense<0xFF800000> : vector<8xf32>
      %77 = vector.multi_reduction <maximumf>, %76, %cst_34 [1] : vector<8x128xf32> to vector<8xf32>
      %78 = vector.shape_cast %77 : vector<8xf32> to vector<8x1xf32>
      %79 = arith.subf %63, %78 : vector<8x1xf32>
      %cst_35 = arith.constant dense<0xFF800000> : vector<8xf32>
      %80 = vector.multi_reduction <maximumf>, %23, %cst_35 [1] : vector<8x128xf32> to vector<8xf32>
      %81 = vector.shape_cast %80 : vector<8xf32> to vector<8x1xf32>
      %82 = vector.broadcast %81 : vector<8x1xf32> to vector<8x128xf32>
      %83 = arith.cmpf oeq, %23, %82 : vector<8x128xf32>
      %c128_i32_36 = arith.constant 128 : i32
      %84 = vector.shape_cast %17 : vector<1x128xi32> to vector<1x128xi32>
      %85 = vector.broadcast %84 : vector<1x128xi32> to vector<8x128xi32>
      %86 = vector.broadcast %c128_i32_36 : i32 to vector<8x128xi32>
      %87 = arith.select %83, %85, %86 : vector<8x128xi1>, vector<8x128xi32>
      %cst_37 = arith.constant dense<2147483647> : vector<8xi32>
      %88 = vector.multi_reduction <minsi>, %87, %cst_37 [1] : vector<8x128xi32> to vector<8xi32>
      %89 = vector.shape_cast %88 : vector<8xi32> to vector<8x1xi32>
      %90 = vector.broadcast %17 : vector<1x128xi32> to vector<8x128xi32>
      %91 = vector.broadcast %89 : vector<8x1xi32> to vector<8x128xi32>
      %92 = arith.cmpi eq, %90, %91 : vector<8x128xi32>
      %cst_38 = arith.constant 0xFF800000 : f32
      %93 = vector.broadcast %cst_38 : f32 to vector<8x128xf32>
      %94 = arith.select %92, %93, %23 : vector<8x128xi1>, vector<8x128xf32>
      %cst_39 = arith.constant dense<0xFF800000> : vector<8xf32>
      %95 = vector.multi_reduction <maximumf>, %94, %cst_39 [1] : vector<8x128xf32> to vector<8xf32>
      %96 = vector.shape_cast %95 : vector<8xf32> to vector<8x1xf32>
      %97 = arith.subf %81, %96 : vector<8x1xf32>
      %98 = tpu.iota {dimensions = array<i32: 1>} : vector<8x8xi32>
      %cst_40 = arith.constant 0.000000e+00 : f32
      %99 = vector.broadcast %cst_40 : f32 to vector<8x8xf32>
      %c0_i32_41 = arith.constant 0 : i32
      %100 = vector.broadcast %c0_i32_41 : i32 to vector<8x8xi32>
      %101 = arith.cmpi eq, %98, %100 : vector<8x8xi32>
      %102 = vector.shape_cast %35 : vector<8x1xf32> to vector<8x1xf32>
      %103 = vector.broadcast %102 : vector<8x1xf32> to vector<8x8xf32>
      %104 = arith.select %101, %103, %99 : vector<8x8xi1>, vector<8x8xf32>
      %c1_i32 = arith.constant 1 : i32
      %105 = vector.broadcast %c1_i32 : i32 to vector<8x8xi32>
      %106 = arith.cmpi eq, %98, %105 : vector<8x8xi32>
      %107 = vector.shape_cast %42 : vector<8x1xf32> to vector<8x1xf32>
      %108 = vector.broadcast %107 : vector<8x1xf32> to vector<8x8xf32>
      %109 = arith.select %106, %108, %104 : vector<8x8xi1>, vector<8x8xf32>
      %c2_i32 = arith.constant 2 : i32
      %110 = vector.broadcast %c2_i32 : i32 to vector<8x8xi32>
      %111 = arith.cmpi eq, %98, %110 : vector<8x8xi32>
      %112 = vector.shape_cast %50 : vector<8x1xf32> to vector<8x1xf32>
      %113 = vector.broadcast %112 : vector<8x1xf32> to vector<8x8xf32>
      %114 = arith.select %111, %113, %109 : vector<8x8xi1>, vector<8x8xf32>
      %c3_i32 = arith.constant 3 : i32
      %115 = vector.broadcast %c3_i32 : i32 to vector<8x8xi32>
      %116 = arith.cmpi eq, %98, %115 : vector<8x8xi32>
      %117 = vector.shape_cast %79 : vector<8x1xf32> to vector<8x1xf32>
      %118 = vector.broadcast %117 : vector<8x1xf32> to vector<8x8xf32>
      %119 = arith.select %116, %118, %114 : vector<8x8xi1>, vector<8x8xf32>
      %c4_i32 = arith.constant 4 : i32
      %120 = vector.broadcast %c4_i32 : i32 to vector<8x8xi32>
      %121 = arith.cmpi eq, %98, %120 : vector<8x8xi32>
      %122 = vector.shape_cast %97 : vector<8x1xf32> to vector<8x1xf32>
      %123 = vector.broadcast %122 : vector<8x1xf32> to vector<8x8xf32>
      %124 = arith.select %121, %123, %119 : vector<8x8xi1>, vector<8x8xf32>
      %c0_42 = arith.constant 0 : index
      %c0_43 = arith.constant 0 : index
      %125 = vector.load %arg7[%c0_42, %c0_43] : memref<8x8xf32, #tpu.memory_space<vmem>>, vector<8x8xf32>
      tpu.vector_store %arg7[%c0_42, %c0_43], %124 {strides = array<i32>} : memref<8x8xf32, #tpu.memory_space<vmem>>, vector<8x8xf32>,
    } else {
    }
    return
  }
  func.func @transform_0(%arg0: i32, %arg1: i32) -> (i32, i32) {
    %c0_i32 = arith.constant 0 : i32
    return %arg0, %arg1 : i32, i32
  }
  func.func @transform_1(%arg0: i32, %arg1: i32) -> (i32, i32) {
    %c0_i32 = arith.constant 0 : i32
    %c0_i32_0 = arith.constant 0 : i32
    return %arg1, %c0_i32 : i32, i32
  }
  func.func @transform_2(%arg0: i32, %arg1: i32) -> (i32, i32) {
    %c0_i32 = arith.constant 0 : i32
    %c0_i32_0 = arith.constant 0 : i32
    %c0_i32_1 = arith.constant 0 : i32
    return %c0_i32, %c0_i32_0 : i32, i32
  }
  func.func @transform_3(%arg0: i32, %arg1: i32) -> (i32, i32) {
    %c0_i32 = arith.constant 0 : i32
    %c0_i32_0 = arith.constant 0 : i32
    %c0_i32_1 = arith.constant 0 : i32
    return %c0_i32, %c0_i32_0 : i32, i32
  }
  func.func @transform_4(%arg0: i32, %arg1: i32) -> (i32, i32) {
    %c0_i32 = arith.constant 0 : i32
    %c0_i32_0 = arith.constant 0 : i32
    return %arg0, %c0_i32 : i32, i32
  }
  func.func @transform_5(%arg0: i32, %arg1: i32) -> (i32, i32) {
    %c0_i32 = arith.constant 0 : i32
    %c0_i32_0 = arith.constant 0 : i32
    return %arg0, %c0_i32 : i32, i32
  }
}

</mosaic_0001>

<bundles_post_ra>
// kernel: tpu_custom_call.1
= control target key start
LH: loop header
LB: loop body
LE: loop exit
PB: predicated region body
PF: predicated region fallthrough
CT: control target
= control target key end

     0   :  { %11 = vsyncpa [#allocation3], 0  ;;  %s1365_s0 = inlined_call_operand.hbm [shape: bf16[8,1024], index: 0, kind: input, shape index: {}]   ;;  %s1366_s1 = inlined_call_operand.hbm [shape: bf16[1024,128], index: 1, kind: input, shape index: {}]   ;;  %s1367_s2 = inlined_call_operand.vmem [shape: f32[1,128], index: 2, kind: input, shape index: {}]   ;;  %s1368_s3 = inlined_call_operand.vmem [shape: f32[1,128], index: 3, kind: input, shape index: {}]   ;;  %s1369_s4 = inlined_call_operand.hbm [shape: f32[8,128], index: 4, kind: output, shape index: {0}]   ;;  %s1370_s5 = inlined_call_operand.hbm [shape: f32[8,8], index: 5, kind: output, shape index: {1}]  }
   0x1   :  { %12 = vsyncpa [#allocation6], 0 }
   0x2   :  { %13 = vsyncpa [#allocation4], 0 }
   0x3   :  { %14 = vsyncpa [#allocation9], 0  ;;  %s1247_s18 = smov [#allocation2]   ;;  %s1248_s20 = smov [#allocation5]  }
   0x4   :  { %s21_s19 = sshll.u32 %s1247_s18, 4  ;;  %s30_s21 = sshll.u32 %s1248_s20, 4  ;;  %s22_s19 = int_to_ptr.vmem [resolvable:$true] %s21_s19  ;;  %s1283_s21 = int_to_ptr.vmem [resolvable:$true] %s30_s21 }
   0x5   :  { %s1151_s24 = scalar_lea.hbm %s1365_s0, 512 }
   0x6   :  { %p1152_p0 = scmp.ne.s32.totalorder %s1365_s0, %s1151_s24  ;;  %p1155_p1 = scmp.lt.u32.totalorder %s1151_s24, %s1365_s0 }
   0x8   :  { %p1157_p2 = pnand %p1155_p1, %p1152_p0 }
   0xa   :  { %1160 = shalt.err (!%p1157_p2)
}
   0xb   :  { %s1161_s29 = scalar_lea.vmem %s22_s19, 512  ;;  %p1166_p4 = scmp.lt.s32.totalorder %s22_s19, %s22_s19 }
   0xc   :  { %p1162_p3 = scmp.ne.s32.totalorder %s22_s19, %s1161_s29  ;;  %p1167_p5 = scmp.lt.s32.totalorder %s1161_s29, %s1161_s29 }
   0xe   :  { %p1168_p6 = por %p1167_p5, %p1166_p4 }
  0x10   :  { %p1169_p7 = pnand %p1168_p6, %p1162_p3 }
  0x12   :  { %1172 = shalt.err (!%p1169_p7)
}
  0x13   :  { %24 = dma.hbm_to_vmem [thread:$0]  %s1365_s0, 512, %s22_s19, [#allocation3]  }
  0x14   :  { %s1173_s9 = scalar_lea.hbm %s1366_s1, 8192 }
  0x15   :  { %p1174_p8 = scmp.ne.s32.totalorder %s1366_s1, %s1173_s9  ;;  %p1177_p9 = scmp.lt.u32.totalorder %s1173_s9, %s1366_s1 }
  0x17   :  { %p1179_p10 = pnand %p1177_p9, %p1174_p8 }
  0x19   :  { %1182 = shalt.err (!%p1179_p10)
}
  0x1a   :  { %s1183_s14 = scalar_lea.vmem %s1283_s21, 8192  ;;  %p1188_p12 = scmp.lt.s32.totalorder %s1283_s21, %s1283_s21 }
  0x1b   :  { %p1184_p11 = scmp.ne.s32.totalorder %s1283_s21, %s1183_s14  ;;  %p1189_p13 = scmp.lt.s32.totalorder %s1183_s14, %s1183_s14 }
  0x1d   :  { %p1190_p0 = por %p1189_p13, %p1188_p12 }
  0x1f   :  { %p1191_p1 = pnand %p1190_p0, %p1184_p11 }
  0x21   :  { %1194 = shalt.err (!%p1191_p1)
}
  0x22   :  { %s1249_s0 = smov 64   ;;  %s1250_s15 = smov 4  }
  0x23   :  { %36 = dma.hbm_to_vmem [thread:$0]  %s1366_s1, 8192, %s1283_s21, [#allocation6], %s1249_s0, %s1249_s0, %s1250_s15  }
  0x24   :  { %1239 = dma.done.wait [#allocation3], 512  }
  0x25   :  { %1240 = vsyncadd [#allocation3], 4294966784 }
  0x26   :  { %1241 = dma.done.wait [#allocation6], 8192  }
  0x27   :  { %1242 = vsyncadd [#allocation6], 4294959104  ;;  %v1069_v0 = vld [vmem:[#allocation5 + $0x40] sm:$0xff]   ;;  %v1073_v4 = vld [vmem:[#allocation5 + $0x48] sm:$0xff]  }
  0x28   :  { %v1070_v1 = vld [vmem:[#allocation5 + $0xc0] sm:$0xff]   ;;  %974 = vmatprep.subr.bf16.mxu0 %v1069_v0  ;;  %v1074_v5 = vld [vmem:[#allocation5 + $0xc8] sm:$0xff]   ;;  %v1077_v8 = vld [vmem:[#allocation5 + $0x50] sm:$0xff]  }
  0x29   :  { %v1071_v2 = vld [vmem:[#allocation5] sm:$0xff]   ;;  %996 = vmatprep.subr.bf16.mxu1 %v1070_v1  ;;  %v1075_v6 = vld [vmem:[#allocation5 + $0x8] sm:$0xff]   ;;  %v1078_v9 = vld [vmem:[#allocation5 + $0xd0] sm:$0xff]  }
  0x2a   :  { %v1072_v3 = vld [vmem:[#allocation5 + $0x80] sm:$0xff]   ;;  %975 = vmatpush3.bf16.msra.mxu0 %v1071_v2  ;;  %v1076_v7 = vld [vmem:[#allocation5 + $0x88] sm:$0xff]   ;;  %v1079_v10 = vld [vmem:[#allocation5 + $0x10] sm:$0xff]  }
  0x2b   :  { %997 = vmatpush3.bf16.msra.mxu1 %v1072_v3  ;;  %976 = vmatprep.subr.bf16.mxu0 %v1073_v4  ;;  %v1080_v11 = vld [vmem:[#allocation5 + $0x90] sm:$0xff]   ;;  %v1081_v12 = vld [vmem:[#allocation5 + $0x58] sm:$0xff]   ;;  %v1085_v16 = vld [vmem:[#allocation5 + $0x60] sm:$0xff]  }
  0x2c   :  { %998 = vmatprep.subr.bf16.mxu1 %v1074_v5  ;;  %v1082_v13 = vld [vmem:[#allocation5 + $0xd8] sm:$0xff]   ;;  %v1086_v17 = vld [vmem:[#allocation5 + $0xe0] sm:$0xff]   ;;  %v1089_v20 = vld [vmem:[#allocation5 + $0x68] sm:$0xff]  }
  0x2d   :  { %v1083_v14 = vld [vmem:[#allocation5 + $0x18] sm:$0xff]   ;;  %v1087_v18 = vld [vmem:[#allocation5 + $0x20] sm:$0xff]   ;;  %v1090_v21 = vld [vmem:[#allocation5 + $0xe8] sm:$0xff]  }
  0x2e   :  { %977 = vmatpush3.bf16.msra.mxu0 %v1075_v6  ;;  %v1084_v15 = vld [vmem:[#allocation5 + $0x98] sm:$0xff]   ;;  %v1088_v19 = vld [vmem:[#allocation5 + $0xa0] sm:$0xff]   ;;  %v1091_v22 = vld [vmem:[#allocation5 + $0x28] sm:$0xff]  }
  0x2f   :  { %999 = vmatpush3.bf16.msra.mxu1 %v1076_v7  ;;  %978 = vmatprep.subr.bf16.mxu0 %v1077_v8  ;;  %v1092_v23 = vld [vmem:[#allocation5 + $0xa8] sm:$0xff]   ;;  %v1093_v24 = vld [vmem:[#allocation5 + $0x70] sm:$0xff]   ;;  %v1097_v28 = vld [vmem:[#allocation5 + $0x78] sm:$0xff]  }
  0x30   :  { %1000 = vmatprep.subr.bf16.mxu1 %v1078_v9  ;;  %v1094_v25 = vld [vmem:[#allocation5 + $0xf0] sm:$0xff]   ;;  %v1098_v29 = vld [vmem:[#allocation5 + $0xf8] sm:$0xff]   ;;  %v54_v32 = vld [vmem:[#allocation2] sm:$0xff] }
  0x31   :  { %v1095_v26 = vld [vmem:[#allocation5 + $0x30] sm:$0xff]   ;;  %v1099_v30 = vld [vmem:[#allocation5 + $0x38] sm:$0xff]   ;;  %v55_v33 = vld [vmem:[#allocation2 + $0x8] sm:$0xff]  ;;  %v901_v34 = vcombine.low %v54_v32, %v54_v32  ;;  %v902_v35 = vcombine.high %v54_v32, %v54_v32 }
  0x32   :  { %979 = vmatpush3.bf16.msra.mxu0 %v1079_v10  ;;  %v1096_v27 = vld [vmem:[#allocation5 + $0xb0] sm:$0xff]   ;;  %v1100_v31 = vld [vmem:[#allocation5 + $0xb8] sm:$0xff]   ;;  %v903_v36 = vcombine.low %v55_v33, %v55_v33  ;;  %v904_v37 = vcombine.high %v55_v33, %v55_v33  ;;  %v1105_v38 = vld [vmem:[#allocation5 + $0x140] sm:$0xff]  }
  0x33   :  { %1001 = vmatpush3.bf16.msra.mxu1 %v1080_v11  ;;  %980 = vmatprep.subr.bf16.mxu0 %v1081_v12  ;;  %v1106_v39 = vld [vmem:[#allocation5 + $0x1c0] sm:$0xff]   ;;  %v1109_v42 = vld [vmem:[#allocation5 + $0x148] sm:$0xff]   ;;  %v1113_v46 = vld [vmem:[#allocation5 + $0x150] sm:$0xff]  }
  0x34   :  { %1002 = vmatprep.subr.bf16.mxu1 %v1082_v13  ;;  %630 = vmatprep.mubr.bf16.mxu0 %v902_v35  ;;  %v1107_v40 = vld [vmem:[#allocation5 + $0x100] sm:$0xff]   ;;  %v1110_v43 = vld [vmem:[#allocation5 + $0x1c8] sm:$0xff]   ;;  %v1114_v47 = vld [vmem:[#allocation5 + $0x1d0] sm:$0xff]  }
  0x35   :  { %670 = vmatprep.mubr.bf16.mxu1 %v904_v37  ;;  %v1108_v41 = vld [vmem:[#allocation5 + $0x180] sm:$0xff]   ;;  %v1111_v44 = vld [vmem:[#allocation5 + $0x108] sm:$0xff]   ;;  %v1115_v48 = vld [vmem:[#allocation5 + $0x110] sm:$0xff]  }
  0x36   :  { %981 = vmatpush3.bf16.msra.mxu0 %v1083_v14  ;;  %v1112_v45 = vld [vmem:[#allocation5 + $0x188] sm:$0xff]   ;;  %v1116_v49 = vld [vmem:[#allocation5 + $0x190] sm:$0xff]   ;;  %v1117_v50 = vld [vmem:[#allocation5 + $0x158] sm:$0xff]  }
  0x37   :  { %1003 = vmatpush3.bf16.msra.mxu1 %v1084_v15  ;;  %982 = vmatprep.subr.bf16.mxu0 %v1085_v16  ;;  %v1118_v51 = vld [vmem:[#allocation5 + $0x1d8] sm:$0xff]   ;;  %v1121_v54 = vld [vmem:[#allocation5 + $0x160] sm:$0xff]   ;;  %v1125_v58 = vld [vmem:[#allocation5 + $0x168] sm:$0xff]  }
  0x38   :  { %1004 = vmatprep.subr.bf16.mxu1 %v1086_v17  ;;  %v1119_v52 = vld [vmem:[#allocation5 + $0x118] sm:$0xff]   ;;  %v1122_v55 = vld [vmem:[#allocation5 + $0x1e0] sm:$0xff]   ;;  %v1126_v59 = vld [vmem:[#allocation5 + $0x1e8] sm:$0xff]  }
  0x39   :  { %v1120_v53 = vld [vmem:[#allocation5 + $0x198] sm:$0xff]   ;;  %v1123_v56 = vld [vmem:[#allocation5 + $0x120] sm:$0xff]   ;;  %v1127_v60 = vld [vmem:[#allocation5 + $0x128] sm:$0xff]  }
  0x3a   :  { %983 = vmatpush3.bf16.msra.mxu0 %v1087_v18  ;;  %v1124_v57 = vld [vmem:[#allocation5 + $0x1a0] sm:$0xff]   ;;  %v1128_v61 = vld [vmem:[#allocation5 + $0x1a8] sm:$0xff]   ;;  %v1129_v62 = vld [vmem:[#allocation5 + $0x170] sm:$0xff]  }
  0x3b   :  { %1005 = vmatpush3.bf16.msra.mxu1 %v1088_v19  ;;  %984 = vmatprep.subr.bf16.mxu0 %v1089_v20  ;;  %v1130_v63 = vld [vmem:[#allocation5 + $0x1f0] sm:$0xff]   ;;  %v1133_v2 = vld [vmem:[#allocation5 + $0x178] sm:$0xff]  }
  0x3c   :  { %1006 = vmatprep.subr.bf16.mxu1 %v1090_v21  ;;  %v1131_v0 = vld [vmem:[#allocation5 + $0x130] sm:$0xff]   ;;  %v1134_v3 = vld [vmem:[#allocation5 + $0x1f8] sm:$0xff]  }
  0x3d   :  { %v1132_v1 = vld [vmem:[#allocation5 + $0x1b0] sm:$0xff]   ;;  %v1135_v4 = vld [vmem:[#allocation5 + $0x138] sm:$0xff]  }
  0x3e   :  { %985 = vmatpush3.bf16.msra.mxu0 %v1091_v22  ;;  %v1136_v5 = vld [vmem:[#allocation5 + $0x1b8] sm:$0xff]   ;;  %v56_v6 = vld [vmem:[#allocation2 + $0x10] sm:$0xff] }
  0x3f   :  { %1007 = vmatpush3.bf16.msra.mxu1 %v1092_v23  ;;  %986 = vmatprep.subr.bf16.mxu0 %v1093_v24  ;;  %v905_v7 = vcombine.low %v56_v6, %v56_v6  ;;  %v906_v8 = vcombine.high %v56_v6, %v56_v6  ;;  %v57_v9 = vld [vmem:[#allocation2 + $0x18] sm:$0xff]  ;;  %v803_v23 = vld [vmem:[%s1368_s3] sm:$0x1] }
  0x40   :  { %1008 = vmatprep.subr.bf16.mxu1 %v1094_v25  ;;  %v907_v10 = vcombine.low %v57_v9, %v57_v9  ;;  %v908_v11 = vcombine.high %v57_v9, %v57_v9  ;;  %v804_v24 = vadd.f32 1e-08, %v803_v23  ;;  %v773_v25 = vlaneseq }
  0x42   :  { %987 = vmatpush3.bf16.msra.mxu0 %v1095_v26  ;;  %1141 = vrcp.f32 %v804_v24 }
  0x43   :  { %1009 = vmatpush3.bf16.msra.mxu1 %v1096_v27  ;;  %988 = vmatprep.subr.bf16.mxu0 %v1097_v28  ;;  %v809_v28 = vshrl.u32 %v773_v25, 7 }
  0x44   :  { %1010 = vmatprep.subr.bf16.mxu1 %v1098_v29 }
  0x46   :  { %989 = vmatpush3.bf16.msra.mxu0 %v1099_v30 }
  0x47   :  { %1011 = vmatpush3.bf16.msra.mxu1 %v1100_v31  ;;  %1018 = vmatprep.subr.bf16.mxu0 %v1105_v38  ;;  %v810_v38 = vsub.s32 0, %v809_v28 }
  0x48   :  { %1040 = vmatprep.subr.bf16.mxu1 %v1106_v39 }
  0x49   :  { %631 = vmatmul.mubr.bf16.vlgmr.msra.gmra.mrb[0].mxu0 %v901_v34 }
  0x4a   :  { %671 = vmatmul.mubr.bf16.vlgmr.msra.gmra.mrb[0].mxu1 %v903_v36  ;;  %1019 = vmatpush3.bf16.msra.mxu0 %v1107_v40 }
  0x4b   :  { %1041 = vmatpush3.bf16.msra.mxu1 %v1108_v41  ;;  %1020 = vmatprep.subr.bf16.mxu0 %v1109_v42  ;;  %v973_v41 = vld [vmem:[%s1367_s2] ss:$0 sm:$0xff]  ;;  %s1251_s2 = smov [#allocation7]  }
  0x4c   :  { %1042 = vmatprep.subr.bf16.mxu1 %v1110_v43  ;;  %710 = vmatprep.mubr.bf16.mxu0 %v906_v8  ;;  %v1142_v39 = vpop.eup %1141  ;;  %v1320_v43 = vand.u32 127, %v773_v25  ;;  %s877_s20 = sshll.u32 %s1251_s2, 4  ;;  %s878_s20 = int_to_ptr.vmem [resolvable:$true] %s877_s20 }
  0x4d   :  { %750 = vmatprep.mubr.bf16.mxu1 %v908_v11  ;;  %v811_v42 = vrot.slane %v1142_v39, %v810_v38  ;;  %s1195_s21 = scalar_lea.vmem %s878_s20, 128  ;;  %p1200_p3 = scmp.lt.s32.totalorder %s878_s20, %s878_s20 }
  0x4e   :  { %1021 = vmatpush3.bf16.msra.mxu0 %v1111_v44  ;;  %vm775_vm0 = vcmp.lt.s32.totalorder %v1320_v43, 16  ;;  %p1196_p2 = scmp.ne.s32.totalorder %s878_s20, %s1195_s21  ;;  %p1201_p4 = scmp.lt.s32.totalorder %s1195_s21, %s1195_s21 }
  0x4f   :  { %1043 = vmatpush3.bf16.msra.mxu1 %v1112_v45  ;;  %1022 = vmatprep.subr.bf16.mxu0 %v1113_v46 }
  0x50   :  { %1044 = vmatprep.subr.bf16.mxu1 %v1114_v47  ;;  %p1202_p5 = por %p1201_p4, %p1200_p3 }
  0x52   :  { %1023 = vmatpush3.bf16.msra.mxu0 %v1115_v48  ;;  %p1203_p6 = pnand %p1202_p5, %p1196_p2 }
  0x53   :  { %1045 = vmatpush3.bf16.msra.mxu1 %v1116_v49  ;;  %1024 = vmatprep.subr.bf16.mxu0 %v1117_v50 }
  0x54   :  { %1046 = vmatprep.subr.bf16.mxu1 %v1118_v51 }
  0x56   :  { %1025 = vmatpush3.bf16.msra.mxu0 %v1119_v52 }
  0x57   :  { %1047 = vmatpush3.bf16.msra.mxu1 %v1120_v53  ;;  %1026 = vmatprep.subr.bf16.mxu0 %v1121_v54 }
  0x58   :  { %1048 = vmatprep.subr.bf16.mxu1 %v1122_v55 }
  0x5a   :  { %1027 = vmatpush3.bf16.msra.mxu0 %v1123_v56 }
  0x5b   :  { %1049 = vmatpush3.bf16.msra.mxu1 %v1124_v57  ;;  %1028 = vmatprep.subr.bf16.mxu0 %v1125_v58 }
  0x5c   :  { %1050 = vmatprep.subr.bf16.mxu1 %v1126_v59 }
  0x5e   :  { %1029 = vmatpush3.bf16.msra.mxu0 %v1127_v60 }
  0x5f   :  { %1051 = vmatpush3.bf16.msra.mxu1 %v1128_v61  ;;  %1030 = vmatprep.subr.bf16.mxu0 %v1129_v62 }
  0x60   :  { %1052 = vmatprep.subr.bf16.mxu1 %v1130_v63 }
  0x62   :  { %1031 = vmatpush3.bf16.msra.mxu0 %v1131_v0 }
  0x63   :  { %1053 = vmatpush3.bf16.msra.mxu1 %v1132_v1  ;;  %1032 = vmatprep.subr.bf16.mxu0 %v1133_v2 }
  0x64   :  { %1054 = vmatprep.subr.bf16.mxu1 %v1134_v3 }
  0x66   :  { %1033 = vmatpush3.bf16.msra.mxu0 %v1135_v4 }
  0x67   :  { %1055 = vmatpush3.bf16.msra.mxu1 %v1136_v5 }
  0x69   :  { %711 = vmatmul.mubr.bf16.vlgmr.msra.gmra.mrb[4].mxu0 %v905_v7 }
  0x6a   :  { %751 = vmatmul.mubr.bf16.vlgmr.msra.gmra.mrb[4].mxu1 %v907_v10 }
 0x11c   :  { %v990_v12 = vpop.f32.mrb[0].mxu0 }
 0x11d   :  { %v1012_v13 = vpop.f32.mrb[0].mxu1  ;;  %v991_v14 = vpop.f32.mrb[1].mxu0 }
 0x11e   :  { %v1013_v15 = vpop.f32.mrb[1].mxu1  ;;  %v992_v16 = vadd.f32 %v991_v14, %v990_v12  ;;  %v993_v18 = vpop.f32.mrb[2].mxu0 }
 0x11f   :  { %v1014_v17 = vadd.f32 %v1013_v15, %v1012_v13  ;;  %v1015_v19 = vpop.f32.mrb[2].mxu1  ;;  %v994_v20 = vpop.f32.mrb[3].mxu0 }
 0x120   :  { %v1016_v21 = vpop.f32.mrb[3].mxu1 }
 0x121   :  { %v673_v22 = vadd.f32 %v1014_v17, %v992_v16 }
 0x13c   :  { %v1034_v26 = vpop.f32.mrb[4].mxu0 }
 0x13d   :  { %v1056_v27 = vpop.f32.mrb[4].mxu1  ;;  %v1035_v29 = vpop.f32.mrb[5].mxu0 }
 0x13e   :  { %v1057_v30 = vpop.f32.mrb[5].mxu1  ;;  %v1036_v31 = vadd.f32 %v1035_v29, %v1034_v26  ;;  %v1037_v33 = vpop.f32.mrb[6].mxu0 }
 0x13f   :  { %v1058_v32 = vadd.f32 %v1057_v30, %v1056_v27  ;;  %v1059_v34 = vpop.f32.mrb[6].mxu1  ;;  %v1038_v35 = vpop.f32.mrb[7].mxu0 }
 0x140   :  { %v1060_v36 = vpop.f32.mrb[7].mxu1  ;;  %v713_v37 = vadd.f32 %v1036_v31, %v673_v22 }
 0x142   :  { %v753_v40 = vadd.f32 %v1058_v32, %v713_v37 }
 0x144   :  { %v771_v44 = vadd.f32 %v973_v41, %v753_v40 }
 0x146   :  { %v813_v45 = vmul.f32 %v811_v42, %v771_v44  ;;  %772 = vst [vmem:[#allocation7] sm:$0xff] %v771_v44  ;;  %v778_v47 = vsel %vm775_vm0, %v771_v44, -inf }
 0x148   :  { %v814_v46 = vsel %vm775_vm0, %v813_v45, -inf }
 0x149   :  { %815 = vmax.xlane.f32.xlu0 %v814_v46 }
 0x14d   :  { %779 = vmax.xlane.f32.xlu0 %v778_v47 }
 0x1d6   :  { %v1323_v48 = vpop.xlane.xlu0 %815 }
 0x1d7   :  { %vm817_vm1 = vcmp.eq.f32.partialorder %v814_v46, %v1323_v48 }
 0x1d8   :  { %v818_v49 = vsel %vm817_vm1, %v1320_v43, 128 }
 0x1d9   :  { %v820_v50 = vshra.s32 %v818_v49, 16  ;;  %v819_v59 = vand.u32 65535, %v818_v49 }
 0x1da   :  { %v1327_v51 = vpop.xlane.xlu0 %779 }
 0x1db   :  { %v781_v52 = vsub.f32 %v778_v47, %v1327_v51  ;;  %vm838_vm2 = vcmp.eq.f32.partialorder %v778_v47, %v1327_v51  ;;  %v822_v53 = vcvt.s32.f32 %v820_v50  ;;  %v821_v61 = vcvt.s32.f32 %v819_v59 }
 0x1dc   :  { %v839_v54 = vsel %vm838_vm2, %v1320_v43, 128 }
 0x1dd   :  { %v782_v55 = vmul.f32 1.442695, %v781_v52  ;;  %823 = vmin.xlane.f32.xlu1 %v822_v53  ;;  %v841_v56 = vshra.s32 %v839_v54, 16  ;;  %v840_v62 = vand.u32 65535, %v839_v54 }
 0x1df   :  { %1143 = vpow2.f32 %v782_v55  ;;  %v843_v57 = vcvt.s32.f32 %v841_v56  ;;  %v842_v1 = vcvt.s32.f32 %v840_v62 }
 0x1e1   :  { %844 = vmin.xlane.f32.xlu1 %v843_v57 }
 0x1e9   :  { %v1144_v58 = vpop.eup %1143 }
 0x1ea   :  { %784 = vadd.xlane.f32.xlu0 %v1144_v58 }
 0x26a   :  { %v824_v60 = vpop.xlane.xlu1 %823 }
 0x26b   :  { %vm825_vm3 = vcmp.eq.f32.partialorder %v822_v53, %v824_v60  ;;  %v830_v11 = vcvt.f32.s32 %v824_v60 }
 0x26c   :  { %v826_v63 = vsel %vm825_vm3, %v821_v61, inf }
 0x26d   :  { %827 = vmin.xlane.f32.xlu1 %v826_v63  ;;  %v831_v13 = vshll.u32 %v830_v11, 16 }
 0x26e   :  { %v845_v0 = vpop.xlane.xlu1 %844 }
 0x26f   :  { %vm846_vm4 = vcmp.eq.f32.partialorder %v843_v57, %v845_v0  ;;  %v851_v14 = vcvt.f32.s32 %v845_v0 }
 0x270   :  { %v847_v2 = vsel %vm846_vm4, %v842_v1, inf }
 0x271   :  { %848 = vmin.xlane.f32.xlu0 %v847_v2  ;;  %v852_v18 = vshll.u32 %v851_v14, 16 }
 0x277   :  { %v785_v3 = vpop.xlane.xlu0 %784 }
 0x278   :  { %1145 = vrcp.f32 %v785_v3 }
 0x282   :  { %v1146_v4 = vpop.eup %1145 }
 0x283   :  { %v787_v5 = vmul.f32 %v1146_v4, %v1144_v58 }
 0x285   :  { %788 = vmax.xlane.f32.xlu0 %v787_v5  ;;  %v790_v6 = vmul.f32 %v787_v5, %v787_v5  ;;  %v796_v7 = vadd.f32 1e-10, %v787_v5 }
 0x287   :  { %791 = vadd.xlane.f32.xlu1 %v790_v6  ;;  %1147 = vlog2.f32 %v796_v7 }
 0x291   :  { %v1148_v8 = vpop.eup %1147 }
 0x292   :  { %v798_v9 = vmul.f32 0.6931472, %v1148_v8 }
 0x294   :  { %v799_v10 = vmul.f32 %v798_v9, %v787_v5 }
 0x296   :  { %800 = vadd.xlane.f32.xlu1 %v799_v10 }
 0x2fa   :  { %v828_v12 = vpop.xlane.xlu1 %827 }
 0x2fb   :  { %v829_v15 = vcvt.f32.s32 %v828_v12 }
 0x2fd   :  { %v832_v16 = vadd.s32 %v831_v13, %v829_v15 }
 0x2fe   :  { %v849_v17 = vpop.xlane.xlu0 %848 }
 0x2ff   :  { %v850_v19 = vcvt.f32.s32 %v849_v17  ;;  %vm833_vm5 = vcmp.eq.s32.totalorder %v1320_v43, %v832_v16 }
 0x300   :  { %v834_v20 = vsel %vm833_vm5, -inf, %v814_v46 }
 0x301   :  { %v853_v21 = vadd.s32 %v852_v18, %v850_v19  ;;  %835 = vmax.xlane.f32.xlu0 %v834_v20 }
 0x303   :  { %vm854_vm6 = vcmp.eq.s32.totalorder %v1320_v43, %v853_v21 }
 0x304   :  { %v855_v22 = vsel %vm854_vm6, -inf, %v778_v47 }
 0x305   :  { %856 = vmax.xlane.f32.xlu1 %v855_v22 }
 0x306   :  { %1206 = shalt.err (!%p1203_p6)
}
 0x307   :  { %s1207_s24 = scalar_lea.hbm %s1369_s4, 128 }
 0x308   :  { %p1208_p7 = scmp.ne.s32.totalorder %s1369_s4, %s1207_s24  ;;  %p1211_p8 = scmp.lt.u32.totalorder %s1207_s24, %s1369_s4 }
 0x30a   :  { %p1213_p9 = pnand %p1211_p8, %p1208_p7 }
 0x30c   :  { %1216 = shalt.err (!%p1213_p9)
}
 0x30d   :  { %880 = dma.vmem_to_hbm [thread:$0]  %s878_s20, 128, %s1369_s4, [#allocation4]   ;;  %vm859_vm7 = vcmp.eq.s32.totalorder %v1320_v43, 0  ;;  %vm861_vm8 = vcmp.eq.s32.totalorder %v1320_v43, 1  ;;  %vm863_vm9 = vcmp.eq.s32.totalorder %v1320_v43, 2  ;;  %vm865_vm10 = vcmp.eq.s32.totalorder %v1320_v43, 3 }
 0x30e   :  { %s1252_s4 = smov [#allocation8]   ;;  %vm867_vm11 = vcmp.eq.s32.totalorder %v1320_v43, 4  ;;  %vm869_vm12 = vcmask 64512  }
 0x30f   :  { %s887_s6 = sshll.u32 %s1252_s4, 4  ;;  %s888_s6 = int_to_ptr.vmem [resolvable:$true] %s887_s6 }
 0x310   :  { %s1217_s7 = scalar_lea.vmem %s888_s6, 128  ;;  %p1222_p11 = scmp.lt.s32.totalorder %s888_s6, %s888_s6 }
 0x311   :  { %p1218_p10 = scmp.ne.s32.totalorder %s888_s6, %s1217_s7  ;;  %p1223_p12 = scmp.lt.s32.totalorder %s1217_s7, %s1217_s7 }
 0x312   :  { %v789_v24 = vpop.xlane.xlu0 %788 }
 0x313   :  { %v860_v31 = vsel %vm859_vm7, %v789_v24, 0.0  ;;  %p1224_p13 = por %p1223_p12, %p1222_p11 }
 0x314   :  { %v792_v23 = vpop.xlane.xlu1 %791 }
 0x315   :  { %1149 = vrcp.f32 %v792_v23  ;;  %p1225_p0 = pnand %p1224_p13, %p1218_p10 }
 0x31f   :  { %v1150_v25 = vpop.eup %1149 }
 0x320   :  { %v795_v27 = vsub.f32 1.0, %v1150_v25 }
 0x322   :  { %v862_v32 = vsel %vm861_vm8, %v795_v27, %v860_v31 }
 0x323   :  { %v801_v26 = vpop.xlane.xlu1 %800 }
 0x324   :  { %v802_v29 = vsub.f32 0.0, %v801_v26 }
 0x326   :  { %v864_v34 = vsel %vm863_vm9, %v802_v29, %v862_v32 }
 0x38e   :  { %v836_v28 = vpop.xlane.xlu0 %835 }
 0x38f   :  { %v837_v30 = vsub.f32 %v1323_v48, %v836_v28 }
 0x391   :  { %v866_v36 = vsel %vm865_vm10, %v837_v30, %v864_v34 }
 0x392   :  { %v857_v33 = vpop.xlane.xlu1 %856 }
 0x393   :  { %v858_v35 = vsub.f32 %v1327_v51, %v857_v33 }
 0x395   :  { %v868_v37 = vsel %vm867_vm11, %v858_v35, %v866_v36 }
 0x396   :  { %870 = vst.msk [vmem:[#allocation8] sm:$0xff] %vm869_vm12, %v868_v37 }
 0x397   :  { %1228 = shalt.err (!%p1225_p0)
}
 0x398   :  { %s1229_s10 = scalar_lea.hbm %s1370_s5, 128 }
 0x399   :  { %p1230_p1 = scmp.ne.s32.totalorder %s1370_s5, %s1229_s10  ;;  %p1233_p2 = scmp.lt.u32.totalorder %s1229_s10, %s1370_s5 }
 0x39b   :  { %p1235_p3 = pnand %p1233_p2, %p1230_p1 }
 0x39d   :  { %1238 = shalt.err (!%p1235_p3)
}
 0x39e   :  { %890 = dma.vmem_to_hbm [thread:$0]  %s888_s6, 128, %s1370_s5, [#allocation9]  }
 0x39f   :  { %1243 = dma.done.wait [#allocation4], 128  }
 0x3a0   :  { %1244 = vsyncadd [#allocation4], 4294967168 }
 0x3a1   :  { %1245 = dma.done.wait [#allocation9], 128  }
 0x3a2   :  { %1246 = vsyncadd [#allocation9], 4294967168 }
 0x3a3   :  { %897 = vsyncpa [#allocation3], 1 }
 0x3a4   :  { %898 = vsyncpa [#allocation6], 1 }
 0x3a5   :  { %899 = vsyncpa [#allocation4], 1 }
 0x3a6   :  { %900 = vsyncpa [#allocation9], 1 }

</bundles_post_ra>
